<compile_context>
chip_gen: v7x
topology: tpu7x:2x2x1
jax: 0.10.0
libtpu: 0.0.40
codegen_flags: <defaults>
</compile_context>

<pallas_src>
import functools

import jax
import jax.numpy as jnp
from jax.experimental import pallas as pl
from jax.experimental.pallas import tpu as pltpu


# Rows (matrices) per grid step. (TB,16) f32 input block = 512 KiB, packed
# (TB,12) output block = 384 KiB; with double-buffering ~1.8 MiB of VMEM,
# safely below default scoped limits on v5e (16 MiB), v6e (32 MiB), v7x (32 MiB).
_TB_MAX = 8192


def _round_up(x: int, m: int) -> int:
    return ((x + m - 1) // m) * m


def _decompose_kernel(m_ref, out_ref, *, order: str):
    # m_ref:   (TB, 16) -- each row is a 4x4 matrix in row-major order.
    # out_ref: (TB, 12) -- [R00..R22 (9 floats) | t (3 floats)] packed.
    m = m_ref[...]
    r0 = m[:, 0:3]    # matrix row 0, cols 0..2
    r1 = m[:, 4:7]    # matrix row 1, cols 0..2
    r2 = m[:, 8:11]   # matrix row 2, cols 0..2
    if order == "row":
        # translation = matrix[3, :3] -> flat elements 12..14
        t = m[:, 12:15]
    else:  # "column"
        # translation = matrix[:3, 3] -> flat elements 3, 7, 11
        t = jnp.concatenate([m[:, 3:4], m[:, 7:8], m[:, 11:12]], axis=-1)
    out_ref[...] = jnp.concatenate([r0, r1, r2, t], axis=-1)


def decompose_matrix(matrix: jax.Array, order: str = "row"):
    """Pallas equivalent of DecomposeMatrix.forward.

    Accepts (..., 4, 4) float matrices, returns a dict with
    'rotation' (..., 3, 3) and 'translation' (..., 3).
    """
    if order not in ("row", "column"):
        raise ValueError(f"Unknown order: {order}")
    if matrix.shape[-2:] != (4, 4):
        raise ValueError(f"Expected trailing (4, 4) matrix, got {matrix.shape}")

    lead = matrix.shape[:-2]
    b = 1
    for d in lead:
        b *= d

    # Lane-dense 2-D layout: one matrix per row of 16 floats (free reshape).
    m_flat = matrix.reshape(b, 16)

    # Tile size: multiple of 8 (sublane constraint), capped at _TB_MAX.
    tb = min(_TB_MAX, _round_up(max(b, 1), 8))
    b_pad = _round_up(max(b, 1), tb)
    if b_pad != b:
        m_flat = jnp.pad(m_flat, ((0, b_pad - b), (0, 0)))

    kernel = functools.partial(_decompose_kernel, order=order)

    packed = pl.pallas_call(
        kernel,
        out_shape=jax.ShapeDtypeStruct((b_pad, 12), matrix.dtype),
        grid=(b_pad // tb,),
        in_specs=[pl.BlockSpec((tb, 16), lambda i: (i, 0))],
        out_specs=pl.BlockSpec((tb, 12), lambda i: (i, 0)),
        compiler_params=pltpu.CompilerParams(
            dimension_semantics=("parallel",),
        ),
        cost_estimate=pl.CostEstimate(
            flops=0,
            transcendentals=0,
            bytes_accessed=b_pad * 16 * 4 + b_pad * 12 * 4,
        ),
    )(m_flat)

    packed = packed[:b]
    rotation = packed[:, :9].reshape(*lead, 3, 3)
    translation = packed[:, 9:12].reshape(*lead, 3)
    return {"rotation": rotation, "translation": translation}


def _reference(matrix: jax.Array, order: str):
    if order == "row":
        if matrix.ndim == 3:
            t = matrix[:, 3, :3]
        else:
            t = matrix[:, :, 3, :3]
        r = matrix[..., :3, :3]
    else:
        r = matrix[..., :3, :3]
        t = matrix[..., :3, 3]
    return {"rotation": r, "translation": t}


if __name__ == "__main__":
    key = jax.random.PRNGKey(0)
    k1, k2 = jax.random.split(key)

    # 3D case: (B, 4, 4)
    m3 = jax.random.normal(k1, (2, 4, 4), dtype=jnp.float32)
    # 4D case: (B, N, 4, 4)
    m4 = jax.random.normal(k2, (2, 3, 4, 4), dtype=jnp.float32)

    ok = True
    for m in (m3, m4):
        for order in ("row", "column"):
            out = decompose_matrix(m, order=order)
            out = jax.tree_util.tree_map(jax.block_until_ready, out)
            ref = _reference(m, order)
            ok &= bool(jnp.allclose(out["rotation"], ref["rotation"]))
            ok &= bool(jnp.allclose(out["translation"], ref["translation"]))

    if ok:
        print("KERNEL_OK")
    else:
        print("KERNEL_MISMATCH")
</pallas_src>

<mosaic_0001>
module attributes {stable_mosaic.version = 11 : i64} {
  func.func @_decompose_kernel(%arg0: i32, %arg1: memref<8x16xf32, #tpu.memory_space<vmem>>, %arg2: memref<8x12xf32, #tpu.memory_space<vmem>>) attributes {dimension_semantics = [#tpu.dimension_semantics<parallel>], iteration_bounds = array<i64: 1>, scalar_prefetch = 0 : i64, scratch_operands = 0 : i64, tpu.core_type = #tpu.core_type<tc>, window_params = [{transform_indices = @transform_0, window_bounds = array<i64: 8, 16>}, {transform_indices = @transform_1, window_bounds = array<i64: 8, 12>}]} {
    %c0 = arith.constant 0 : index
    %c0_0 = arith.constant 0 : index
    %0 = vector.load %arg1[%c0, %c0_0] : memref<8x16xf32, #tpu.memory_space<vmem>>, vector<8x16xf32>
    %1 = vector.extract_strided_slice %0 {offsets = [0, 0], sizes = [8, 3], strides = [1, 1]} : vector<8x16xf32> to vector<8x3xf32>
    %2 = vector.extract_strided_slice %0 {offsets = [0, 4], sizes = [8, 3], strides = [1, 1]} : vector<8x16xf32> to vector<8x3xf32>
    %3 = vector.extract_strided_slice %0 {offsets = [0, 8], sizes = [8, 3], strides = [1, 1]} : vector<8x16xf32> to vector<8x3xf32>
    %4 = vector.extract_strided_slice %0 {offsets = [0, 12], sizes = [8, 3], strides = [1, 1]} : vector<8x16xf32> to vector<8x3xf32>
    %5 = tpu.concatenate %1, %2, %3, %4 in 1 : vector<8x3xf32>, vector<8x3xf32>, vector<8x3xf32>, vector<8x3xf32> -> vector<8x12xf32>
    %c0_1 = arith.constant 0 : index
    %c0_2 = arith.constant 0 : index
    %6 = vector.load %arg2[%c0_1, %c0_2] : memref<8x12xf32, #tpu.memory_space<vmem>>, vector<8x12xf32>
    tpu.vector_store %arg2[%c0_1, %c0_2], %5 {strides = array<i32>} : memref<8x12xf32, #tpu.memory_space<vmem>>, vector<8x12xf32>,
    return
  }
  func.func @transform_0(%arg0: i32) -> (i32, i32) {
    %c0_i32 = arith.constant 0 : i32
    %c0_i32_0 = arith.constant 0 : i32
    return %arg0, %c0_i32 : i32, i32
  }
  func.func @transform_1(%arg0: i32) -> (i32, i32) {
    %c0_i32 = arith.constant 0 : i32
    %c0_i32_0 = arith.constant 0 : i32
    return %arg0, %c0_i32 : i32, i32
  }
}

</mosaic_0001>

<bundles_post_ra>
// kernel: tpu_custom_call.1
= control target key start
LH: loop header
LB: loop body
LE: loop exit
PB: predicated region body
PF: predicated region fallthrough
CT: control target
= control target key end

     0   :  { %6 = vsyncpa [#allocation3], 0  ;;  %s147_s0 = inlined_call_operand.hbm [shape: f32[8,16], index: 0, kind: input, shape index: {}]   ;;  %s148_s1 = inlined_call_operand.hbm [shape: f32[8,12], index: 1, kind: output, shape index: {}]  }
   0x1   :  { %7 = vsyncpa [#allocation4], 0  ;;  %s108_s6 = smov [#allocation2]   ;;  %s60_s10 = scalar_lea.hbm %s147_s0, 128 }
   0x2   :  { %s14_s7 = sshll.u32 %s108_s6, 4  ;;  %p61_p0 = scmp.ne.s32.totalorder %s147_s0, %s60_s10  ;;  %s15_s7 = int_to_ptr.vmem [resolvable:$true] %s14_s7 }
   0x3   :  { %p64_p1 = scmp.lt.u32.totalorder %s60_s10, %s147_s0 }
   0x5   :  { %p66_p2 = pnand %p64_p1, %p61_p0 }
   0x7   :  { %69 = shalt.err (!%p66_p2)
}
   0x8   :  { %s70_s15 = scalar_lea.vmem %s15_s7, 128  ;;  %p75_p4 = scmp.lt.s32.totalorder %s15_s7, %s15_s7 }
   0x9   :  { %p71_p3 = scmp.ne.s32.totalorder %s15_s7, %s70_s15  ;;  %p76_p5 = scmp.lt.s32.totalorder %s70_s15, %s70_s15 }
   0xb   :  { %p77_p6 = por %p76_p5, %p75_p4 }
   0xd   :  { %p78_p7 = pnand %p77_p6, %p71_p3 }
   0xf   :  { %81 = shalt.err (!%p78_p7)
}
  0x10   :  { %17 = dma.hbm_to_vmem [thread:$0]  %s147_s0, 128, %s15_s7, [#allocation3]  }
  0x11   :  { %104 = dma.done.wait [#allocation3], 128  }
  0x12   :  { %105 = vsyncadd [#allocation3], 4294967168  ;;  %v21_v0 = vld [vmem:[#allocation2] sm:$0xff]  ;;  %s109_s18 = smov 127   ;;  %s110_s19 = smov 125   ;;  %vm32_vm0 = vcmask 23552  }
  0x13   :  { %23 = vrot.lane.b32.xlu0 %v21_v0, %s109_s18  ;;  %29 = vrot.lane.b32.xlu1 %v21_v0, %s110_s19  ;;  %s111_s20 = smov 126   ;;  %vm34_vm1 = vcmask 48128   ;;  %s112_s21 = smov [#allocation5]   ;;  %vm36_vm2 = vcmask 72704   ;;  %vm38_vm3 = vcmask 97280  }
  0x14   :  { %s46_s22 = sshll.u32 %s112_s21, 4  ;;  %s47_s22 = int_to_ptr.vmem [resolvable:$true] %s46_s22 }
  0x15   :  { %s82_s0 = scalar_lea.vmem %s47_s22, 128  ;;  %p87_p9 = scmp.lt.s32.totalorder %s47_s22, %s47_s22 }
  0x16   :  { %p83_p8 = scmp.ne.s32.totalorder %s47_s22, %s82_s0  ;;  %p88_p10 = scmp.lt.s32.totalorder %s82_s0, %s82_s0 }
  0x17   :  { %26 = vrot.lane.b32.xlu0 %v21_v0, %s111_s20 }
  0x18   :  { %p89_p11 = por %p88_p10, %p87_p9 }
  0x1a   :  { %p90_p12 = pnand %p89_p11, %p83_p8 }
  0x85   :  { %v24_v1 = vpop.permute.xlu0 %23  ;;  %v30_v2 = vpop.permute.xlu1 %29 }
  0x86   :  { %v33_v3 = vsel %vm32_vm0, %v21_v0, %v24_v1 }
  0x89   :  { %v27_v4 = vpop.permute.xlu0 %26 }
  0x8a   :  { %v35_v5 = vsel %vm34_vm1, %v33_v3, %v27_v4 }
  0x8b   :  { %v37_v6 = vsel %vm36_vm2, %v35_v5, %v30_v2 }
  0x8c   :  { %39 = vst.msk [vmem:[#allocation5] sm:$0xff] %vm38_vm3, %v37_v6 }
  0x8d   :  { %93 = shalt.err (!%p90_p12)
}
  0x8e   :  { %s94_s25 = scalar_lea.hbm %s148_s1, 128 }
  0x8f   :  { %p95_p13 = scmp.ne.s32.totalorder %s148_s1, %s94_s25  ;;  %p98_p0 = scmp.lt.u32.totalorder %s94_s25, %s148_s1 }
  0x91   :  { %p100_p1 = pnand %p98_p0, %p95_p13 }
  0x93   :  { %103 = shalt.err (!%p100_p1)
}
  0x94   :  { %49 = dma.vmem_to_hbm [thread:$0]  %s47_s22, 128, %s148_s1, [#allocation4]  }
  0x95   :  { %106 = dma.done.wait [#allocation4], 128  }
  0x96   :  { %107 = vsyncadd [#allocation4], 4294967168 }
  0x97   :  { %53 = vsyncpa [#allocation3], 1 }
  0x98   :  { %54 = vsyncpa [#allocation4], 1 }

</bundles_post_ra>
